<compile_context>
chip_gen: v6e
topology: v6e:2x2x1
jax: 0.10.0
libtpu: 0.0.40
codegen_flags: <defaults>
</compile_context>

<pallas_src>
import functools
from functools import partial

import jax
import jax.numpy as jnp
from jax.experimental import pallas as pl
from jax.experimental.pallas import tpu as pltpu


def _round_up(v, m):
    return ((v + m - 1) // m) * m


def _style_kernel(*refs, depth):
    # refs = (x_ref, w0, b0, w1, b1, ..., w_{depth-1}, b_{depth-1}, out_ref)
    x_ref = refs[0]
    out_ref = refs[-1]
    wb = refs[1:-1]

    x = x_ref[...].astype(jnp.float32)

    # F.normalize(x, dim=1): x / max(||x||_2, 1e-12) == x * rsqrt(max(||x||^2, 1e-24)).
    sq = jnp.sum(x * x, axis=-1, keepdims=True)
    x = x * jax.lax.rsqrt(jnp.maximum(sq, 1e-24))

    # depth x [Linear -> LeakyReLU(0.1)]; bf16 MXU inputs, f32 accumulate/epilogue.
    for i in range(depth):
        w = wb[2 * i][...]                       # bf16 (dim_in_p, dim_out_p)
        b = wb[2 * i + 1][...]                   # f32  (1, dim_out_p)
        y = jnp.dot(x.astype(jnp.bfloat16), w,
                    preferred_element_type=jnp.float32) + b
        x = jnp.where(y >= 0.0, y, 0.1 * y)

    out_ref[...] = x.astype(out_ref.dtype)


@partial(jax.custom_vjp, nondiff_argnums=(1,))
def _frac_gradient(x, frac):
    # Value-identity; gradient scaled by `frac` (== x*frac + (1-frac)*stop_gradient(x)).
    return x


def _frac_gradient_fwd(x, frac):
    return x, None


def _frac_gradient_bwd(frac, _, g):
    return (g * frac,)


_frac_gradient.defvjp(_frac_gradient_fwd, _frac_gradient_bwd)


def style_network_forward(x, text_latent, weights, biases,
                          frac_gradient=0.1, block_batch=256):
    """weights[i]: (dim_in_i, dim) (already transposed for x @ w); biases[i]: (1, dim)."""
    if text_latent is not None:
        x = jnp.concatenate((x, text_latent), axis=-1)

    depth = len(weights)
    batch, dim_in0 = x.shape
    dim = weights[-1].shape[1]

    # ---- lane-dense padding of feature axes (multiples of 128) ----
    dims_in = [w.shape[0] for w in weights]
    dims_out = [w.shape[1] for w in weights]
    dims_in_p = [_round_up(d, 128) for d in dims_in]
    dims_out_p = [_round_up(d, 128) for d in dims_out]
    dim_in0_p, dim_p = dims_in_p[0], dims_out_p[-1]

    # ---- batch tiling (TB multiple of 8 sublanes; full batch if small) ----
    tb = min(block_batch, _round_up(batch, 8))
    batch_p = _round_up(batch, tb)
    grid = (batch_p // tb,)

    x_p = jnp.zeros((batch_p, dim_in0_p), x.dtype).at[:batch, :dim_in0].set(x)

    w_p, b_p = [], []
    for w, b, dip, dop in zip(weights, biases, dims_in_p, dims_out_p):
        b2 = jnp.reshape(b, (1, -1))
        wp = jnp.zeros((dip, dop), jnp.bfloat16).at[:w.shape[0], :w.shape[1]].set(
            w.astype(jnp.bfloat16))
        bp = jnp.zeros((1, dop), jnp.float32).at[:, :b2.shape[1]].set(
            b2.astype(jnp.float32))
        w_p.append(wp)
        b_p.append(bp)

    kernel = functools.partial(_style_kernel, depth=depth)

    in_arrays = [x_p]
    in_specs = [pl.BlockSpec((tb, dim_in0_p), lambda i: (i, 0))]
    for wp, bp in zip(w_p, b_p):
        in_arrays.extend([wp, bp])
        # Constant block index -> weights/biases stay resident across batch grid steps.
        in_specs.append(pl.BlockSpec(wp.shape, lambda i: (0, 0)))
        in_specs.append(pl.BlockSpec(bp.shape, lambda i: (0, 0)))

    # VMEM budget: 2x weights (default double-buffering) + double-buffered activation
    # tiles + f32 intermediates, with headroom; capped at 64 MiB for v7x portability.
    bytes_w = sum(int(w.size) * 2 for w in w_p) + sum(int(b.size) * 4 for b in b_p)
    bytes_act = 2 * tb * (dim_in0_p + dim_p) * 4
    bytes_tmp = 4 * tb * max(dims_in_p + dims_out_p) * 4
    vmem_limit = int(min(max((2 * bytes_w + bytes_act + bytes_tmp) * 1.25,
                             16 << 20), 64 << 20))

    out_p = pl.pallas_call(
        kernel,
        out_shape=jax.ShapeDtypeStruct((batch_p, dim_p), x.dtype),
        grid=grid,
        in_specs=in_specs,
        out_specs=pl.BlockSpec((tb, dim_p), lambda i: (i, 0)),
        compiler_params=pltpu.CompilerParams(
            dimension_semantics=("parallel",),   # megacore: shard batch tiles on v7x
            vmem_limit_bytes=vmem_limit,
        ),
    )(*in_arrays)

    out = out_p[:batch, :dim]
    # Gradient-fraction trick: identical forward value, gradient scaled by frac.
    return _frac_gradient(out, frac_gradient)


def _reference(x, text_latent, weights, biases):
    if text_latent is not None:
        x = jnp.concatenate((x, text_latent), axis=-1)
    x = x.astype(jnp.float32)
    norm = jnp.sqrt(jnp.sum(x * x, axis=-1, keepdims=True))
    x = x / jnp.maximum(norm, 1e-12)
    for w, b in zip(weights, biases):
        x = x @ w + jnp.reshape(b, (1, -1))
        x = jnp.where(x >= 0, x, 0.1 * x)
    return x


if __name__ == "__main__":
    # Small shapes consistent with the module.
    batch = 8
    dim = 32
    depth = 2
    dim_text_latent = 16

    key = jax.random.PRNGKey(0)
    kx, kt, *kws = jax.random.split(key, 2 + 2 * depth)

    x = jax.random.normal(kx, (batch, dim), dtype=jnp.float32)
    text_latent = jax.random.normal(kt, (batch, dim_text_latent), dtype=jnp.float32)

    # Deterministic parameter init (nn.Linear(dim_in, dim) per layer, pre-transposed).
    weights, biases = [], []
    for i in range(depth):
        dim_in = dim + (dim_text_latent if i == 0 else 0)
        w = jax.random.normal(kws[2 * i], (dim_in, dim), dtype=jnp.float32) * 0.05
        b = jax.random.normal(kws[2 * i + 1], (1, dim), dtype=jnp.float32) * 0.01
        weights.append(w)
        biases.append(b)

    out = style_network_forward(x, text_latent, weights, biases)
    out = jax.block_until_ready(out)

    ref = _reference(x, text_latent, weights, biases)
    assert out.shape == (batch, dim)
    # bf16 MXU inputs -> compare with bf16-appropriate tolerance.
    max_err = float(jnp.max(jnp.abs(out - ref)))
    assert jnp.allclose(out, ref, atol=5e-3, rtol=5e-2), (
        f"mismatch vs pure-JAX reference; max abs err = {max_err}")

    print("KERNEL_OK")
</pallas_src>

<mosaic_0001>
module attributes {stable_mosaic.version = 11 : i64} {
  func.func @_style_kernel(%arg0: i32, %arg1: memref<8x128xf32, #tpu.memory_space<vmem>>, %arg2: memref<128x128xbf16, #tpu.memory_space<vmem>>, %arg3: memref<1x128xf32, #tpu.memory_space<vmem>>, %arg4: memref<128x128xbf16, #tpu.memory_space<vmem>>, %arg5: memref<1x128xf32, #tpu.memory_space<vmem>>, %arg6: memref<8x128xf32, #tpu.memory_space<vmem>>) attributes {dimension_semantics = [#tpu.dimension_semantics<parallel>], iteration_bounds = array<i64: 1>, scalar_prefetch = 0 : i64, scratch_operands = 0 : i64, tpu.core_type = #tpu.core_type<tc>, window_params = [{transform_indices = @transform_0, window_bounds = array<i64: 8, 128>}, {pipeline_mode = #tpu.pipeline_mode<synchronous>, transform_indices = @transform_1, window_bounds = array<i64: 128, 128>}, {pipeline_mode = #tpu.pipeline_mode<synchronous>, transform_indices = @transform_2, window_bounds = array<i64: 1, 128>}, {pipeline_mode = #tpu.pipeline_mode<synchronous>, transform_indices = @transform_3, window_bounds = array<i64: 128, 128>}, {pipeline_mode = #tpu.pipeline_mode<synchronous>, transform_indices = @transform_4, window_bounds = array<i64: 1, 128>}, {transform_indices = @transform_5, window_bounds = array<i64: 8, 128>}]} {
    %c0 = arith.constant 0 : index
    %c0_0 = arith.constant 0 : index
    %0 = vector.load %arg1[%c0, %c0_0] : memref<8x128xf32, #tpu.memory_space<vmem>>, vector<8x128xf32>
    %1 = arith.mulf %0, %0 : vector<8x128xf32>
    %cst = arith.constant dense<0.000000e+00> : vector<8xf32>
    %2 = vector.multi_reduction <add>, %1, %cst [1] : vector<8x128xf32> to vector<8xf32>
    %3 = vector.shape_cast %2 : vector<8xf32> to vector<8x1xf32>
    %cst_1 = arith.constant 1.000000e-24 : f32
    %4 = vector.broadcast %cst_1 : f32 to vector<8x1xf32>
    %5 = arith.maximumf %3, %4 : vector<8x1xf32>
    %6 = math.rsqrt %5 : vector<8x1xf32>
    %7 = vector.broadcast %6 : vector<8x1xf32> to vector<8x128xf32>
    %8 = arith.mulf %0, %7 : vector<8x128xf32>
    %c0_2 = arith.constant 0 : index
    %c0_3 = arith.constant 0 : index
    %9 = vector.load %arg2[%c0_2, %c0_3] : memref<128x128xbf16, #tpu.memory_space<vmem>>, vector<128x128xbf16>
    %c0_4 = arith.constant 0 : index
    %c0_5 = arith.constant 0 : index
    %10 = vector.load %arg3[%c0_4, %c0_5] : memref<1x128xf32, #tpu.memory_space<vmem>>, vector<1x128xf32>
    %11 = arith.truncf %8 : vector<8x128xf32> to vector<8x128xbf16>
    %cst_6 = arith.constant dense<0.000000e+00> : vector<8x128xf32>
    %12 = tpu.matmul %11, %9, %cst_6 {dimension_numbers = #tpu.dot_dimension_numbers<[1], [0], [0], [1], [0, 0, 1, 1], [], []>} : vector<8x128xbf16>, vector<128x128xbf16>, vector<8x128xf32> -> vector<8x128xf32>
    %13 = vector.broadcast %10 : vector<1x128xf32> to vector<8x128xf32>
    %14 = arith.addf %12, %13 : vector<8x128xf32>
    %cst_7 = arith.constant 0.000000e+00 : f32
    %15 = vector.broadcast %cst_7 : f32 to vector<8x128xf32>
    %16 = arith.cmpf oge, %14, %15 : vector<8x128xf32>
    %cst_8 = arith.constant 1.000000e-01 : f32
    %17 = vector.broadcast %cst_8 : f32 to vector<8x128xf32>
    %18 = arith.mulf %17, %14 : vector<8x128xf32>
    %19 = arith.select %16, %14, %18 : vector<8x128xi1>, vector<8x128xf32>
    %c0_9 = arith.constant 0 : index
    %c0_10 = arith.constant 0 : index
    %20 = vector.load %arg4[%c0_9, %c0_10] : memref<128x128xbf16, #tpu.memory_space<vmem>>, vector<128x128xbf16>
    %c0_11 = arith.constant 0 : index
    %c0_12 = arith.constant 0 : index
    %21 = vector.load %arg5[%c0_11, %c0_12] : memref<1x128xf32, #tpu.memory_space<vmem>>, vector<1x128xf32>
    %22 = arith.truncf %19 : vector<8x128xf32> to vector<8x128xbf16>
    %cst_13 = arith.constant dense<0.000000e+00> : vector<8x128xf32>
    %23 = tpu.matmul %22, %20, %cst_13 {dimension_numbers = #tpu.dot_dimension_numbers<[1], [0], [0], [1], [0, 0, 1, 1], [], []>} : vector<8x128xbf16>, vector<128x128xbf16>, vector<8x128xf32> -> vector<8x128xf32>
    %24 = vector.broadcast %21 : vector<1x128xf32> to vector<8x128xf32>
    %25 = arith.addf %23, %24 : vector<8x128xf32>
    %cst_14 = arith.constant 0.000000e+00 : f32
    %26 = vector.broadcast %cst_14 : f32 to vector<8x128xf32>
    %27 = arith.cmpf oge, %25, %26 : vector<8x128xf32>
    %cst_15 = arith.constant 1.000000e-01 : f32
    %28 = vector.broadcast %cst_15 : f32 to vector<8x128xf32>
    %29 = arith.mulf %28, %25 : vector<8x128xf32>
    %30 = arith.select %27, %25, %29 : vector<8x128xi1>, vector<8x128xf32>
    %c0_16 = arith.constant 0 : index
    %c0_17 = arith.constant 0 : index
    %31 = vector.load %arg6[%c0_16, %c0_17] : memref<8x128xf32, #tpu.memory_space<vmem>>, vector<8x128xf32>
    tpu.vector_store %arg6[%c0_16, %c0_17], %30 {strides = array<i32>} : memref<8x128xf32, #tpu.memory_space<vmem>>, vector<8x128xf32>,
    return
  }
  func.func @transform_0(%arg0: i32) -> (i32, i32) {
    %c0_i32 = arith.constant 0 : i32
    %c0_i32_0 = arith.constant 0 : i32
    return %arg0, %c0_i32 : i32, i32
  }
  func.func @transform_1(%arg0: i32) -> (i32, i32) {
    %c0_i32 = arith.constant 0 : i32
    %c0_i32_0 = arith.constant 0 : i32
    %c0_i32_1 = arith.constant 0 : i32
    return %c0_i32, %c0_i32_0 : i32, i32
  }
  func.func @transform_2(%arg0: i32) -> (i32, i32) {
    %c0_i32 = arith.constant 0 : i32
    %c0_i32_0 = arith.constant 0 : i32
    %c0_i32_1 = arith.constant 0 : i32
    return %c0_i32, %c0_i32_0 : i32, i32
  }
  func.func @transform_3(%arg0: i32) -> (i32, i32) {
    %c0_i32 = arith.constant 0 : i32
    %c0_i32_0 = arith.constant 0 : i32
    %c0_i32_1 = arith.constant 0 : i32
    return %c0_i32, %c0_i32_0 : i32, i32
  }
  func.func @transform_4(%arg0: i32) -> (i32, i32) {
    %c0_i32 = arith.constant 0 : i32
    %c0_i32_0 = arith.constant 0 : i32
    %c0_i32_1 = arith.constant 0 : i32
    return %c0_i32, %c0_i32_0 : i32, i32
  }
  func.func @transform_5(%arg0: i32) -> (i32, i32) {
    %c0_i32 = arith.constant 0 : i32
    %c0_i32_0 = arith.constant 0 : i32
    return %arg0, %c0_i32 : i32, i32
  }
}

</mosaic_0001>

<bundles_post_ra>
// kernel: tpu_custom_call.1
= control target key start
LH: loop header
LB: loop body
LE: loop exit
PB: predicated region body
PF: predicated region fallthrough
CT: control target
= control target key end

     0   :  { %10 = vsyncpa [#allocation3], 0  ;;  %s559_s0 = inlined_call_operand.hbm [shape: f32[8,128], index: 0, kind: input, shape index: {}]   ;;  %s560_s1 = inlined_call_operand.hbm [shape: bf16[128,128], index: 1, kind: input, shape index: {}]   ;;  %s561_s2 = inlined_call_operand.vmem [shape: f32[1,128], index: 2, kind: input, shape index: {}]   ;;  %s562_s3 = inlined_call_operand.hbm [shape: bf16[128,128], index: 3, kind: input, shape index: {}]   ;;  %s563_s4 = inlined_call_operand.vmem [shape: f32[1,128], index: 4, kind: input, shape index: {}]   ;;  %s564_s5 = inlined_call_operand.hbm [shape: f32[8,128], index: 5, kind: output, shape index: {}]  }
   0x1   :  { %11 = vsyncpa [#allocation6], 0 }
   0x2   :  { %12 = vsyncpa [#allocation4], 0  ;;  %s503_s18 = smov [#allocation5]  }
   0x3   :  { %s28_s19 = sshll.u32 %s503_s18, 4  ;;  %s29_s19 = int_to_ptr.vmem [resolvable:$true] %s28_s19 }
   0x4   :  { %s425_s20 = scalar_lea.vmem %s29_s19, 1024  ;;  %p430_p1 = scmp.lt.s32.totalorder %s29_s19, %s29_s19 }
   0x5   :  { %p426_p0 = scmp.ne.s32.totalorder %s29_s19, %s425_s20  ;;  %p431_p2 = scmp.lt.s32.totalorder %s425_s20, %s425_s20 }
   0x7   :  { %p432_p3 = por %p431_p2, %p430_p1 }
   0x9   :  { %p433_p4 = pnand %p432_p3, %p426_p0 }
   0xb   :  { %436 = shalt.err (!%p433_p4)
}
   0xc   :  { %s504_s21 = smov 64   ;;  %s505_s22 = smov 4  }
   0xd   :  { %34 = dma.hbm_to_vmem [thread:$0]  %s560_s1, 1024, %s29_s19, [#allocation6], %s504_s21, %s504_s21, %s505_s22  }
   0xe   :  { %s506_s25 = smov [#allocation2]   ;;  %s507_s27 = smov [#allocation7]  }
   0xf   :  { %s19_s26 = sshll.u32 %s506_s25, 4  ;;  %s42_s28 = sshll.u32 %s507_s27, 4  ;;  %s20_s26 = int_to_ptr.vmem [resolvable:$true] %s19_s26  ;;  %s43_s28 = int_to_ptr.vmem [resolvable:$true] %s42_s28 }
  0x10   :  { %s445_s29 = scalar_lea.vmem %s20_s26, 128  ;;  %p450_p6 = scmp.lt.s32.totalorder %s20_s26, %s20_s26 }
  0x11   :  { %p446_p5 = scmp.ne.s32.totalorder %s20_s26, %s445_s29  ;;  %p451_p7 = scmp.lt.s32.totalorder %s445_s29, %s445_s29 }
  0x13   :  { %p452_p8 = por %p451_p7, %p450_p6 }
  0x15   :  { %p453_p9 = pnand %p452_p8, %p446_p5 }
  0x17   :  { %456 = shalt.err (!%p453_p9)
}
  0x18   :  { %22 = dma.hbm_to_vmem [thread:$0]  %s559_s0, 128, %s20_s26, [#allocation3]  }
  0x19   :  { %s465_s7 = scalar_lea.vmem %s43_s28, 1024  ;;  %p470_p11 = scmp.lt.s32.totalorder %s43_s28, %s43_s28 }
  0x1a   :  { %p466_p10 = scmp.ne.s32.totalorder %s43_s28, %s465_s7  ;;  %p471_p12 = scmp.lt.s32.totalorder %s465_s7, %s465_s7 }
  0x1c   :  { %p472_p13 = por %p471_p12, %p470_p11 }
  0x1e   :  { %p473_p0 = pnand %p472_p13, %p466_p10 }
  0x20   :  { %476 = shalt.err (!%p473_p0)
}
  0x21   :  { %48 = dma.hbm_to_vmem [thread:$0]  %s562_s3, 1024, %s43_s28, [#allocation6], %s504_s21, %s504_s21, %s505_s22  }
  0x22   :  { %497 = dma.done.wait [#allocation3], 128  }
  0x23   :  { %498 = vsyncadd [#allocation3], 4294967168 }
  0x24   :  { %499 = dma.done.wait [#allocation6], 2048  }
  0x25   :  { %500 = vsyncadd [#allocation6], 4294965248  ;;  %v508_v0 = vmov 0.0   ;;  %v61_v1 = vld [vmem:[#allocation2] sm:$0xff]  ;;  %v400_v4 = vld [vmem:[#allocation5 + $0x30] sm:$0xff]   ;;  %vm509_vm0 = vmmov 0  }
  0x26   :  { %351 = vmatprep.subr.bf16.mxu0 %v508_v0  ;;  %371 = vmatprep.subr.bf16.mxu1 %v508_v0  ;;  %v62_v2 = vmul.f32 %v61_v1, %v61_v1  ;;  %v399_v3 = vld [vmem:[#allocation5 + $0x38] sm:$0xff]   ;;  %v401_v5 = vld [vmem:[#allocation5 + $0x28] sm:$0xff]   ;;  %v402_v6 = vld [vmem:[#allocation5 + $0x20] sm:$0xff]   ;;  %s510_s11 = smov [#allocation8]  }
  0x27   :  { %352 = vmatpush3.bf16.msra.mxu0 %v399_v3  ;;  %v403_v7 = vld [vmem:[#allocation5 + $0x18] sm:$0xff]   ;;  %367 = vmatprep.mubr.msk.bf16.mxu0 %vm509_vm0, %v508_v0  ;;  %v404_v8 = vld [vmem:[#allocation5 + $0x10] sm:$0xff]   ;;  %v405_v9 = vld [vmem:[#allocation5 + $0x8] sm:$0xff]   ;;  %s305_s12 = sshll.u32 %s510_s11, 4  ;;  %s306_s12 = int_to_ptr.vmem [resolvable:$true] %s305_s12 }
  0x28   :  { %63 = vadd.xlane.f32.xlu0 %v62_v2  ;;  %353 = vmatprep.subr.bf16.mxu0 %v508_v0  ;;  %v406_v10 = vld [vmem:[#allocation5] sm:$0xff]   ;;  %v407_v11 = vld [vmem:[#allocation7 + $0x38] sm:$0xff]   ;;  %v408_v12 = vld [vmem:[#allocation7 + $0x30] sm:$0xff]   ;;  %p482_p2 = scmp.lt.s32.totalorder %s306_s12, %s306_s12 }
  0x29   :  { %387 = vmatprep.mubr.msk.bf16.mxu1 %vm509_vm0, %v508_v0  ;;  %372 = vmatpush3.bf16.msra.mxu1 %v407_v11  ;;  %v409_v13 = vld [vmem:[#allocation7 + $0x28] sm:$0xff]   ;;  %v410_v14 = vld [vmem:[#allocation7 + $0x20] sm:$0xff]   ;;  %v411_v15 = vld [vmem:[#allocation7 + $0x18] sm:$0xff]  }
  0x2a   :  { %373 = vmatprep.subr.bf16.mxu1 %v508_v0  ;;  %v412_v16 = vld [vmem:[#allocation7 + $0x10] sm:$0xff]   ;;  %v413_v22 = vld [vmem:[#allocation7 + $0x8] sm:$0xff]   ;;  %v414_v23 = vld [vmem:[#allocation7] sm:$0xff]  }
  0x2b   :  { %354 = vmatpush3.bf16.msra.mxu0 %v400_v4  ;;  %v315_v24 = vld [vmem:[%s561_s2] ss:$0 sm:$0xff]  ;;  %s477_s2 = scalar_lea.vmem %s306_s12, 128 }
  0x2c   :  { %355 = vmatprep.subr.bf16.mxu0 %v508_v0  ;;  %v324_v33 = vld [vmem:[%s563_s4] ss:$0 sm:$0xff]  ;;  %p478_p1 = scmp.ne.s32.totalorder %s306_s12, %s477_s2  ;;  %p483_p3 = scmp.lt.s32.totalorder %s477_s2, %s477_s2 }
  0x2d   :  { %374 = vmatpush3.bf16.msra.mxu1 %v408_v12 }
  0x2e   :  { %375 = vmatprep.subr.bf16.mxu1 %v508_v0  ;;  %p484_p4 = por %p483_p3, %p482_p2 }
  0x2f   :  { %356 = vmatpush3.bf16.msra.mxu0 %v401_v5 }
  0x30   :  { %357 = vmatprep.subr.bf16.mxu0 %v508_v0  ;;  %p485_p5 = pnand %p484_p4, %p478_p1 }
  0x31   :  { %376 = vmatpush3.bf16.msra.mxu1 %v409_v13 }
  0x32   :  { %377 = vmatprep.subr.bf16.mxu1 %v508_v0 }
  0x33   :  { %358 = vmatpush3.bf16.msra.mxu0 %v402_v6 }
  0x34   :  { %359 = vmatprep.subr.bf16.mxu0 %v508_v0 }
  0x35   :  { %378 = vmatpush3.bf16.msra.mxu1 %v410_v14 }
  0x36   :  { %379 = vmatprep.subr.bf16.mxu1 %v508_v0 }
  0x37   :  { %360 = vmatpush3.bf16.msra.mxu0 %v403_v7 }
  0x38   :  { %361 = vmatprep.subr.bf16.mxu0 %v508_v0 }
  0x39   :  { %380 = vmatpush3.bf16.msra.mxu1 %v411_v15 }
  0x3a   :  { %381 = vmatprep.subr.bf16.mxu1 %v508_v0 }
  0x3b   :  { %362 = vmatpush3.bf16.msra.mxu0 %v404_v8 }
  0x3c   :  { %363 = vmatprep.subr.bf16.mxu0 %v508_v0 }
  0x3d   :  { %382 = vmatpush3.bf16.msra.mxu1 %v412_v16 }
  0x3e   :  { %383 = vmatprep.subr.bf16.mxu1 %v508_v0 }
  0x3f   :  { %364 = vmatpush3.bf16.msra.mxu0 %v405_v9 }
  0x40   :  { %365 = vmatprep.subr.bf16.mxu0 %v508_v0 }
  0x41   :  { %384 = vmatpush3.bf16.msra.mxu1 %v413_v22 }
  0x42   :  { %385 = vmatprep.subr.bf16.mxu1 %v508_v0 }
  0x43   :  { %366 = vmatpush3.bf16.msra.mxu0 %v406_v10 }
  0x45   :  { %386 = vmatpush3.bf16.msra.mxu1 %v414_v23 }
  0xb1   :  { %v64_v17 = vpop.xlane.xlu0 %63 }
  0xb2   :  { %v65_v18 = vmax.f32 %v64_v17, 1e-24 }
  0xb4   :  { %415 = vrsqrt.f32 %v65_v18 }
  0xc1   :  { %v416_v19 = vpop.eup %415 }
  0xc2   :  { %v67_v20 = vmul.f32 %v416_v19, %v61_v1 }
  0xc4   :  { %v85_v21 = vpack.c.bf16 %v67_v20, %v67_v20 }
  0xc6   :  { %368 = vmatmul.mubr.bf16.vlgmr.msra.gmra.mxu0 %v85_v21 }
 0x186   :  { %v174_v25 = vpop.f32.mrf.mxu0 }
 0x187   :  { %v175_v26 = vadd.f32 %v315_v24, %v174_v25 }
 0x188   :  { %v369_v27 = vpop.f32.mrf.mxu0 }
 0x189   :  { %vm180_vm1 = vcmp.ge.f32.partialorder %v175_v26, 0.0  ;;  %v181_v28 = vmul.f32 0.1, %v175_v26 }
 0x18a   :  { %v177_v29 = vpop.f32.mrf.mxu0 }
 0x18b   :  { %v182_v30 = vsel %vm180_vm1, %v175_v26, %v181_v28 }
 0x18c   :  { %v370_v31 = vpop.f32.mrf.mxu0  ;;  %v200_v32 = vpack.c.bf16 %v182_v30, %v182_v30 }
 0x18e   :  { %388 = vmatmul.mubr.bf16.vlgmr.msra.gmra.mxu1 %v200_v32 }
 0x24e   :  { %v289_v34 = vpop.f32.mrf.mxu1 }
 0x24f   :  { %v290_v35 = vadd.f32 %v324_v33, %v289_v34 }
 0x250   :  { %v389_v36 = vpop.f32.mrf.mxu1 }
 0x251   :  { %v296_v37 = vmul.f32 0.1, %v290_v35  ;;  %vm295_vm2 = vcmp.ge.f32.partialorder %v290_v35, 0.0 }
 0x252   :  { %v292_v38 = vpop.f32.mrf.mxu1 }
 0x253   :  { %v297_v39 = vsel %vm295_vm2, %v290_v35, %v296_v37 }
 0x254   :  { %v390_v40 = vpop.f32.mrf.mxu1  ;;  %298 = vst [vmem:[#allocation8] sm:$0xff] %v297_v39 }
 0x255   :  { %488 = shalt.err (!%p485_p5)
}
 0x256   :  { %308 = dma.vmem_to_hbm [thread:$0]  %s306_s12, 128, %s564_s5, [#allocation4]  }
 0x257   :  { %501 = dma.done.wait [#allocation4], 128  }
 0x258   :  { %502 = vsyncadd [#allocation4], 4294967168 }
 0x259   :  { %312 = vsyncpa [#allocation3], 1 }
 0x25a   :  { %313 = vsyncpa [#allocation6], 1 }
 0x25b   :  { %314 = vsyncpa [#allocation4], 1 }

</bundles_post_ra>
